<compile_context>
chip_gen: v6e
topology: v6e:2x2x1
jax: 0.10.0
libtpu: 0.0.40
codegen_flags: <defaults>
</compile_context>

<pallas_src>
import functools

import jax
import jax.numpy as jnp
from jax import lax
from jax.experimental import pallas as pl
from jax.experimental.pallas import tpu as pltpu


_LANE = 128
_VMEM_LIMIT = 32 * 1024 * 1024     # raised scoped-VMEM cap (fits v5e/v6e/v7x)
_TILE_BUDGET = 24 * 1024 * 1024    # headroom below the scoped cap


def _norm_rows_kernel(alpha_ref, bias_ref, x_ref, o_ref, *, feat, eps):
    """Per-row LayerNormalization; rows on sublanes, features on lanes."""
    x = x_ref[...].astype(jnp.float32)                                  # (tile, F)
    mean = jnp.mean(x, axis=-1, keepdims=True)
    xc = x - mean
    var = jnp.sum(xc * xc, axis=-1, keepdims=True) * (1.0 / (feat - 1))  # ddof=1
    scale = alpha_ref[0] * (1.0 / eps)               # fold alpha/eps on scalar path
    out = xc * (lax.rsqrt(var) * scale) + bias_ref[0]  # rsqrt -> EUP slot
    o_ref[...] = out.astype(o_ref.dtype)


def _norm_folded_kernel(alpha_ref, bias_ref, seg_ref, x_ref, o_ref, *, feat, eps):
    """Lane-dense variant for feat < 128: 128//feat rows folded per lane-row.

    Per-segment sums use a resident block-diagonal (128,128) segment matrix on
    the MXU (free for this bandwidth-bound kernel), so every load, store and
    VPU op stays fully lane-dense (no masked vst).
    """
    x = x_ref[...].astype(jnp.float32)                                  # (tile, 128)
    seg = seg_ref[...]                                                  # resident
    mean = jnp.dot(x, seg, preferred_element_type=jnp.float32) * (1.0 / feat)
    xc = x - mean
    var = jnp.dot(xc * xc, seg, preferred_element_type=jnp.float32) * (1.0 / (feat - 1))
    scale = alpha_ref[0] * (1.0 / eps)
    out = xc * (lax.rsqrt(var) * scale) + bias_ref[0]
    o_ref[...] = out.astype(o_ref.dtype)


def _choose_tile(rows, lane, itemsize):
    """Largest row tile whose pipelined footprint stays inside the VMEM budget."""
    sub = {1: 32, 2: 16}.get(itemsize, 8)            # packed-dtype sublane multiple
    # 2x in + 2x out double-buffered (native dtype) + ~5 f32 working copies
    per_row = lane * (4 * itemsize + 5 * 4)
    max_rows = max(sub, (_TILE_BUDGET // per_row) // sub * sub)
    tile = min(rows, max_rows, 8192)
    if tile < rows:
        tile = max(sub, (tile // sub) * sub)
    return tile


def _layer_norm(x, params):
    B, S, F = x.shape
    assert F > 1, "unbiased std (ddof=1) requires features > 1"
    R = B * S
    eps = float(F)                                   # constructor quirk: eps == features
    dtype = x.dtype
    itemsize = jnp.dtype(dtype).itemsize

    # Lane-dense folding when F < 128 divides the 128-lane register evenly.
    # TODO(synk): F that is neither a divisor nor a multiple of 128 (e.g. 96,
    # 200) still uses the rows kernel with lane=F (masked stores); folding
    # lcm(F,128)//128 logical rows per lane-row would keep those lane-dense too.
    fold = (F < _LANE) and (_LANE % F == 0) and ((R * F) % _LANE == 0)
    if fold:
        xf = x.reshape(R * F // _LANE, _LANE)
        kernel = functools.partial(_norm_folded_kernel, feat=F, eps=eps)
    else:
        xf = x.reshape(R, F)
        kernel = functools.partial(_norm_rows_kernel, feat=F, eps=eps)

    rows, lane = xf.shape
    tile = _choose_tile(rows, lane, itemsize)
    # Ragged last block is bounds-handled by Pallas; no pad / slice round-trips.
    n_blocks = pl.cdiv(rows, tile)

    in_specs = [
        pl.BlockSpec(memory_space=pltpu.MemorySpace.SMEM),   # alpha (1,)
        pl.BlockSpec(memory_space=pltpu.MemorySpace.SMEM),   # bias  (1,)
    ]
    args = [params["alpha"], params["bias"]]
    if fold:
        lane_idx = jnp.arange(_LANE, dtype=jnp.int32) // F
        seg = (lane_idx[:, None] == lane_idx[None, :]).astype(jnp.float32)
        # Constant block index -> DMA'd once, stays resident across the grid.
        in_specs.append(pl.BlockSpec((_LANE, _LANE), lambda i: (0, 0)))
        args.append(seg)
    in_specs.append(pl.BlockSpec((tile, lane), lambda i: (i, 0)))        # x rows
    args.append(xf)
    x_idx = len(args) - 1            # x is dead after the norm; reuse its buffer

    out = pl.pallas_call(
        kernel,
        out_shape=jax.ShapeDtypeStruct((rows, lane), dtype),
        grid_spec=pltpu.PrefetchScalarGridSpec(
            num_scalar_prefetch=0,
            grid=(n_blocks,),
            in_specs=in_specs,
            out_specs=pl.BlockSpec((tile, lane), lambda i: (i, 0)),
        ),
        compiler_params=pltpu.CompilerParams(
            dimension_semantics=("parallel",),
            vmem_limit_bytes=_VMEM_LIMIT,
        ),
        input_output_aliases={x_idx: 0},
    )(*args)

    return out.reshape(B, S, F)


def encoder_forward(x, mask, params, layers=()):
    """Encoder forward: run externally supplied layers, then the Pallas LayerNorm."""
    for layer in layers:
        x = layer(x, mask)
    return _layer_norm(x, params)


def _reference_norm(x, params, feat):
    """Pure-JAX reference of the LayerNormalization with eps == features."""
    mean = jnp.mean(x, axis=-1, keepdims=True)
    xc = x - mean
    var = jnp.sum(xc * xc, axis=-1, keepdims=True) / (feat - 1)   # unbiased (ddof=1)
    std = jnp.sqrt(var)
    eps = float(feat)
    return params["alpha"][0] * xc / (std * eps) + params["bias"][0]


if __name__ == "__main__":
    key = jax.random.PRNGKey(0)
    k1, _ = jax.random.split(key)

    batch, seq, features = 2, 8, 32
    x = jax.random.normal(k1, (batch, seq, features), dtype=jnp.float32)
    mask = jnp.ones((batch, 1, 1, seq), dtype=jnp.float32)

    # nn.Parameter(torch.ones(1)) / nn.Parameter(torch.zeros(1))
    params = {
        "alpha": jnp.ones((1,), dtype=jnp.float32),
        "bias": jnp.zeros((1,), dtype=jnp.float32),
    }

    out = encoder_forward(x, mask, params, layers=())
    out = jax.block_until_ready(out)

    ref = _reference_norm(x, params, features)
    assert out.shape == (batch, seq, features)
    err = float(jnp.max(jnp.abs(out - ref)))
    assert jnp.allclose(out, ref, atol=1e-5, rtol=1e-3), f"max abs err {err}"

    print("KERNEL_OK")
</pallas_src>

<mosaic_0001>
module attributes {stable_mosaic.version = 11 : i64} {
  func.func @_norm_folded_kernel(%arg0: i32, %arg1: memref<1xf32, #tpu.memory_space<smem>>, %arg2: memref<1xf32, #tpu.memory_space<smem>>, %arg3: memref<128x128xf32, #tpu.memory_space<vmem>>, %arg4: memref<4x128xf32, #tpu.memory_space<vmem>>, %arg5: memref<4x128xf32, #tpu.memory_space<vmem>>) attributes {dimension_semantics = [#tpu.dimension_semantics<parallel>], iteration_bounds = array<i64: 1>, scalar_prefetch = 0 : i64, scratch_operands = 0 : i64, tpu.core_type = #tpu.core_type<tc>, window_params = [{transform_indices = @transform_0, window_bounds = array<i64: 1>}, {transform_indices = @transform_1, window_bounds = array<i64: 1>}, {pipeline_mode = #tpu.pipeline_mode<synchronous>, transform_indices = @transform_2, window_bounds = array<i64: 128, 128>}, {transform_indices = @transform_3, window_bounds = array<i64: 4, 128>}, {transform_indices = @transform_4, window_bounds = array<i64: 4, 128>}]} {
    %c0 = arith.constant 0 : index
    %c0_0 = arith.constant 0 : index
    %0 = vector.load %arg4[%c0, %c0_0] : memref<4x128xf32, #tpu.memory_space<vmem>>, vector<4x128xf32>
    %c0_1 = arith.constant 0 : index
    %c0_2 = arith.constant 0 : index
    %1 = vector.load %arg3[%c0_1, %c0_2] : memref<128x128xf32, #tpu.memory_space<vmem>>, vector<128x128xf32>
    %cst = arith.constant dense<0.000000e+00> : vector<4x128xf32>
    %2 = tpu.matmul %0, %1, %cst {dimension_numbers = #tpu.dot_dimension_numbers<[1], [0], [0], [1], [0, 0, 1, 1], [], []>} : vector<4x128xf32>, vector<128x128xf32>, vector<4x128xf32> -> vector<4x128xf32>
    %cst_3 = arith.constant 3.125000e-02 : f32
    %3 = vector.broadcast %cst_3 : f32 to vector<4x128xf32>
    %4 = arith.mulf %2, %3 : vector<4x128xf32>
    %5 = arith.subf %0, %4 : vector<4x128xf32>
    %6 = arith.mulf %5, %5 : vector<4x128xf32>
    %cst_4 = arith.constant dense<0.000000e+00> : vector<4x128xf32>
    %7 = tpu.matmul %6, %1, %cst_4 {dimension_numbers = #tpu.dot_dimension_numbers<[1], [0], [0], [1], [0, 0, 1, 1], [], []>} : vector<4x128xf32>, vector<128x128xf32>, vector<4x128xf32> -> vector<4x128xf32>
    %cst_5 = arith.constant 0.0322580636 : f32
    %8 = vector.broadcast %cst_5 : f32 to vector<4x128xf32>
    %9 = arith.mulf %7, %8 : vector<4x128xf32>
    %c0_6 = arith.constant 0 : index
    %10 = memref.load %arg1[%c0_6] : memref<1xf32, #tpu.memory_space<smem>>
    %cst_7 = arith.constant 3.125000e-02 : f32
    %11 = arith.mulf %10, %cst_7 : f32
    %12 = math.rsqrt %9 : vector<4x128xf32>
    %13 = vector.broadcast %11 : f32 to vector<4x128xf32>
    %14 = arith.mulf %12, %13 : vector<4x128xf32>
    %15 = arith.mulf %5, %14 : vector<4x128xf32>
    %c0_8 = arith.constant 0 : index
    %16 = memref.load %arg2[%c0_8] : memref<1xf32, #tpu.memory_space<smem>>
    %17 = vector.broadcast %16 : f32 to vector<4x128xf32>
    %18 = arith.addf %15, %17 : vector<4x128xf32>
    %c0_9 = arith.constant 0 : index
    %c0_10 = arith.constant 0 : index
    %19 = vector.load %arg5[%c0_9, %c0_10] : memref<4x128xf32, #tpu.memory_space<vmem>>, vector<4x128xf32>
    tpu.vector_store %arg5[%c0_9, %c0_10], %18 {strides = array<i32>} : memref<4x128xf32, #tpu.memory_space<vmem>>, vector<4x128xf32>,
    return
  }
  func.func @transform_0(%arg0: i32) -> i32 {
    %c0_i32 = arith.constant 0 : i32
    %c0_i32_0 = arith.constant 0 : i32
    return %c0_i32 : i32
  }
  func.func @transform_1(%arg0: i32) -> i32 {
    %c0_i32 = arith.constant 0 : i32
    %c0_i32_0 = arith.constant 0 : i32
    return %c0_i32 : i32
  }
  func.func @transform_2(%arg0: i32) -> (i32, i32) {
    %c0_i32 = arith.constant 0 : i32
    %c0_i32_0 = arith.constant 0 : i32
    %c0_i32_1 = arith.constant 0 : i32
    return %c0_i32, %c0_i32_0 : i32, i32
  }
  func.func @transform_3(%arg0: i32) -> (i32, i32) {
    %c0_i32 = arith.constant 0 : i32
    %c0_i32_0 = arith.constant 0 : i32
    return %arg0, %c0_i32 : i32, i32
  }
  func.func @transform_4(%arg0: i32) -> (i32, i32) {
    %c0_i32 = arith.constant 0 : i32
    %c0_i32_0 = arith.constant 0 : i32
    return %arg0, %c0_i32 : i32, i32
  }
}

</mosaic_0001>

<bundles_post_ra>
// kernel: tpu_custom_call.1
= control target key start
LH: loop header
LB: loop body
LE: loop exit
PB: predicated region body
PF: predicated region fallthrough
CT: control target
= control target key end

     0   :  { %11 = vsyncpa [#allocation5], 0  ;;  %s493_s0 = inlined_call_operand.<no memory space> [shape: f32[1], index: 0, kind: input, shape index: {}]   ;;  %s494_s1 = inlined_call_operand.<no memory space> [shape: f32[1], index: 1, kind: input, shape index: {}]   ;;  %s495_s2 = inlined_call_operand.hbm [shape: f32[128,128], index: 2, kind: input, shape index: {}]   ;;  %s496_s3 = inlined_call_operand.hbm [shape: f32[4,128], index: 3, kind: input, shape index: {}, may-alias: {3,4}]   ;;  %s497_s4 = inlined_call_operand.hbm [shape: f32[4,128], index: 4, kind: output, shape index: {}, may-alias: {3,4}]  }
   0x1   :  { %12 = vsyncpa [#allocation8], 0 }
   0x2   :  { %13 = vsyncpa [#allocation6], 0  ;;  %s412_s15 = smov [#allocation4]  }
   0x3   :  { %s23_s16 = sshll.u32 %s412_s15, 4  ;;  %s24_s16 = int_to_ptr.vmem [resolvable:$true] %s23_s16 }
   0x4   :  { %s354_s17 = scalar_lea.vmem %s24_s16, 2048  ;;  %p359_p1 = scmp.lt.s32.totalorder %s24_s16, %s24_s16 }
   0x5   :  { %p355_p0 = scmp.ne.s32.totalorder %s24_s16, %s354_s17  ;;  %p360_p2 = scmp.lt.s32.totalorder %s354_s17, %s354_s17 }
   0x7   :  { %p361_p3 = por %p360_p2, %p359_p1 }
   0x9   :  { %p362_p4 = pnand %p361_p3, %p355_p0 }
   0xb   :  { %365 = shalt.err (!%p362_p4)
}
   0xc   :  { %s413_s18 = smov 128   ;;  %s414_s19 = smov 8  }
   0xd   :  { %29 = dma.hbm_to_vmem [thread:$0]  %s495_s2, 2048, %s24_s16, [#allocation5], %s413_s18, %s413_s18, %s414_s19  }
   0xe   :  { %s415_s22 = smov [#allocation7]  }
   0xf   :  { %s36_s23 = sshll.u32 %s415_s22, 4  ;;  %s37_s23 = int_to_ptr.vmem [resolvable:$true] %s36_s23 }
  0x10   :  { %s374_s24 = scalar_lea.vmem %s37_s23, 64  ;;  %p379_p6 = scmp.lt.s32.totalorder %s37_s23, %s37_s23 }
  0x11   :  { %p375_p5 = scmp.ne.s32.totalorder %s37_s23, %s374_s24  ;;  %p380_p7 = scmp.lt.s32.totalorder %s374_s24, %s374_s24 }
  0x13   :  { %p381_p8 = por %p380_p7, %p379_p6 }
  0x15   :  { %p382_p9 = pnand %p381_p8, %p375_p5 }
  0x17   :  { %385 = shalt.err (!%p382_p9)
}
  0x18   :  { %39 = dma.hbm_to_vmem [thread:$0]  %s496_s3, 64, %s37_s23, [#allocation8]  }
  0x19   :  { %406 = dma.done.wait [#allocation5], 2048  }
  0x1a   :  { %407 = vsyncadd [#allocation5], 4294965248 }
  0x1b   :  { %408 = dma.done.wait [#allocation8], 64  }
  0x1c   :  { %409 = vsyncadd [#allocation8], 4294967232  ;;  %v416_v0 = vmov 0.0   ;;  %vm417_vm0 = vmmov 0   ;;  %v62_v1 = vld [vmem:[#allocation4 + $0x78] sm:$0xff]  ;;  %v61_v2 = vld [vmem:[#allocation4 + $0x70] sm:$0xff]  ;;  %v214_v29 = vstv %s494_s1 }
  0x1d   :  { %267 = vmatprep.subr.mxu0 %v416_v0  ;;  %299 = vmatprep.mubr.msk.f32.mxu0 %vm417_vm0, %v416_v0  ;;  %v60_v3 = vld [vmem:[#allocation4 + $0x68] sm:$0xff]  ;;  %v59_v4 = vld [vmem:[#allocation4 + $0x60] sm:$0xff]  ;;  %v58_v5 = vld [vmem:[#allocation4 + $0x58] sm:$0xff]  ;;  %s208_s27 = smul.f32 0.03125, %s493_s0  ;;  %s418_s30 = smov [#allocation9]  }
  0x1e   :  { %302 = vmatprep.subr.mxu1 %v416_v0  ;;  %334 = vmatprep.mubr.msk.f32.mxu1 %vm417_vm0, %v416_v0  ;;  %v57_v6 = vld [vmem:[#allocation4 + $0x50] sm:$0xff]  ;;  %v56_v7 = vld [vmem:[#allocation4 + $0x48] sm:$0xff]  ;;  %v55_v8 = vld [vmem:[#allocation4 + $0x40] sm:$0xff]  ;;  %s223_s5 = sshll.u32 %s418_s30, 4  ;;  %s224_s5 = int_to_ptr.vmem [resolvable:$true] %s223_s5 }
  0x1f   :  { %268 = vmatpush3.msra.mxu0 %v62_v1  ;;  %303 = vmatpush3.msra.mxu1 %v62_v1  ;;  %v54_v9 = vld [vmem:[#allocation4 + $0x38] sm:$0xff]  ;;  %v53_v10 = vld [vmem:[#allocation4 + $0x30] sm:$0xff]  ;;  %v52_v11 = vld [vmem:[#allocation4 + $0x28] sm:$0xff]  ;;  %v210_v26 = vstv %s208_s27  ;;  %s386_s6 = scalar_lea.vmem %s224_s5, 64  ;;  %p391_p11 = scmp.lt.s32.totalorder %s224_s5, %s224_s5 }
  0x20   :  { %269 = vmatprep.subr.mxu0 %v416_v0  ;;  %304 = vmatprep.subr.mxu1 %v416_v0  ;;  %v51_v12 = vld [vmem:[#allocation4 + $0x20] sm:$0xff]  ;;  %v50_v13 = vld [vmem:[#allocation4 + $0x18] sm:$0xff]  ;;  %v49_v14 = vld [vmem:[#allocation4 + $0x10] sm:$0xff]  ;;  %p387_p10 = scmp.ne.s32.totalorder %s224_s5, %s386_s6  ;;  %p392_p12 = scmp.lt.s32.totalorder %s386_s6, %s386_s6 }
  0x21   :  { %270 = vmatpush3.msra.mxu0 %v61_v2  ;;  %305 = vmatpush3.msra.mxu1 %v61_v2  ;;  %v48_v15 = vld [vmem:[#allocation4 + $0x8] sm:$0xff]  ;;  %v47_v16 = vld [vmem:[#allocation4] sm:$0xff] }
  0x22   :  { %271 = vmatprep.subr.mxu0 %v416_v0  ;;  %306 = vmatprep.subr.mxu1 %v416_v0  ;;  %v46_v17 = vld [vmem:[#allocation7] sm:$0xf]  ;;  %p393_p13 = por %p392_p12, %p391_p11 }
  0x23   :  { %272 = vmatpush3.msra.mxu0 %v60_v3  ;;  %307 = vmatpush3.msra.mxu1 %v60_v3 }
  0x24   :  { %273 = vmatprep.subr.mxu0 %v416_v0  ;;  %308 = vmatprep.subr.mxu1 %v416_v0  ;;  %p394_p0 = pnand %p393_p13, %p387_p10 }
  0x25   :  { %274 = vmatpush3.msra.mxu0 %v59_v4  ;;  %309 = vmatpush3.msra.mxu1 %v59_v4 }
  0x26   :  { %275 = vmatprep.subr.mxu0 %v416_v0  ;;  %310 = vmatprep.subr.mxu1 %v416_v0 }
  0x27   :  { %276 = vmatpush3.msra.mxu0 %v58_v5  ;;  %311 = vmatpush3.msra.mxu1 %v58_v5 }
  0x28   :  { %277 = vmatprep.subr.mxu0 %v416_v0  ;;  %312 = vmatprep.subr.mxu1 %v416_v0 }
  0x29   :  { %278 = vmatpush3.msra.mxu0 %v57_v6  ;;  %313 = vmatpush3.msra.mxu1 %v57_v6 }
  0x2a   :  { %279 = vmatprep.subr.mxu0 %v416_v0  ;;  %314 = vmatprep.subr.mxu1 %v416_v0 }
  0x2b   :  { %280 = vmatpush3.msra.mxu0 %v56_v7  ;;  %315 = vmatpush3.msra.mxu1 %v56_v7 }
  0x2c   :  { %281 = vmatprep.subr.mxu0 %v416_v0  ;;  %316 = vmatprep.subr.mxu1 %v416_v0 }
  0x2d   :  { %282 = vmatpush3.msra.mxu0 %v55_v8  ;;  %317 = vmatpush3.msra.mxu1 %v55_v8 }
  0x2e   :  { %283 = vmatprep.subr.mxu0 %v416_v0  ;;  %318 = vmatprep.subr.mxu1 %v416_v0 }
  0x2f   :  { %284 = vmatpush3.msra.mxu0 %v54_v9  ;;  %319 = vmatpush3.msra.mxu1 %v54_v9 }
  0x30   :  { %285 = vmatprep.subr.mxu0 %v416_v0  ;;  %320 = vmatprep.subr.mxu1 %v416_v0 }
  0x31   :  { %286 = vmatpush3.msra.mxu0 %v53_v10  ;;  %321 = vmatpush3.msra.mxu1 %v53_v10 }
  0x32   :  { %287 = vmatprep.subr.mxu0 %v416_v0  ;;  %322 = vmatprep.subr.mxu1 %v416_v0 }
  0x33   :  { %288 = vmatpush3.msra.mxu0 %v52_v11  ;;  %323 = vmatpush3.msra.mxu1 %v52_v11 }
  0x34   :  { %289 = vmatprep.subr.mxu0 %v416_v0  ;;  %324 = vmatprep.subr.mxu1 %v416_v0 }
  0x35   :  { %290 = vmatpush3.msra.mxu0 %v51_v12  ;;  %325 = vmatpush3.msra.mxu1 %v51_v12 }
  0x36   :  { %291 = vmatprep.subr.mxu0 %v416_v0  ;;  %326 = vmatprep.subr.mxu1 %v416_v0 }
  0x37   :  { %292 = vmatpush3.msra.mxu0 %v50_v13  ;;  %327 = vmatpush3.msra.mxu1 %v50_v13 }
  0x38   :  { %293 = vmatprep.subr.mxu0 %v416_v0  ;;  %328 = vmatprep.subr.mxu1 %v416_v0 }
  0x39   :  { %294 = vmatpush3.msra.mxu0 %v49_v14  ;;  %329 = vmatpush3.msra.mxu1 %v49_v14 }
  0x3a   :  { %295 = vmatprep.subr.mxu0 %v416_v0  ;;  %330 = vmatprep.subr.mxu1 %v416_v0 }
  0x3b   :  { %296 = vmatpush3.msra.mxu0 %v48_v15  ;;  %331 = vmatpush3.msra.mxu1 %v48_v15 }
  0x3c   :  { %297 = vmatprep.subr.mxu0 %v416_v0  ;;  %332 = vmatprep.subr.mxu1 %v416_v0 }
  0x3d   :  { %298 = vmatpush3.msra.mxu0 %v47_v16  ;;  %333 = vmatpush3.msra.mxu1 %v47_v16 }
  0x3e   :  { %300 = vmatmul.mubr.f32.vlgmr.msra.gmra.mxu0 %v46_v17 }
  0xfe   :  { %v129_v18 = vpop.f32.mrf.mxu0 }
  0xff   :  { %v133_v19 = vmul.f32 0.03125, %v129_v18 }
 0x100   :  { %v301_v20 = vpop.f32.mrf.mxu0 }
 0x101   :  { %v134_v21 = vsub.f32 %v46_v17, %v133_v19 }
 0x103   :  { %v135_v22 = vmul.f32 %v134_v21, %v134_v21 }
 0x105   :  { %335 = vmatmul.mubr.f32.vlgmr.msra.gmra.mxu1 %v135_v22 }
 0x1c5   :  { %v202_v23 = vpop.f32.mrf.mxu1 }
 0x1c6   :  { %v206_v24 = vmul.f32 0.032258064, %v202_v23 }
 0x1c7   :  { %v336_v25 = vpop.f32.mrf.mxu1 }
 0x1c8   :  { %344 = vrsqrt.f32 %v206_v24 }
 0x1d5   :  { %v345_v27 = vpop.eup %344 }
 0x1d6   :  { %v211_v28 = vmul.f32 %v345_v27, %v210_v26 }
 0x1d8   :  { %v212_v30 = vmul.f32 %v211_v28, %v134_v21 }
 0x1da   :  { %v215_v31 = vadd.f32 %v214_v29, %v212_v30 }
 0x1dc   :  { %216 = vst [vmem:[#allocation9] sm:$0xf] %v215_v31 }
 0x1dd   :  { %397 = shalt.err (!%p394_p0)
}
 0x1de   :  { %226 = dma.vmem_to_hbm [thread:$0]  %s224_s5, 64, %s497_s4, [#allocation6]  }
 0x1df   :  { %410 = dma.done.wait [#allocation6], 64  }
 0x1e0   :  { %411 = vsyncadd [#allocation6], 4294967232 }
 0x1e1   :  { %230 = vsyncpa [#allocation5], 1 }
 0x1e2   :  { %231 = vsyncpa [#allocation8], 1 }
 0x1e3   :  { %232 = vsyncpa [#allocation6], 1 }

</bundles_post_ra>
